<compile_context>
chip_gen: v7x
topology: tpu7x:2x2x1
jax: 0.10.0
libtpu: 0.0.40
codegen_flags: <defaults>
</compile_context>

<pallas_src>
import functools
import math

import numpy as np
import jax
import jax.numpy as jnp
from jax import lax
from jax.experimental import pallas as pl
from jax.experimental.pallas import tpu as pltpu


def _ffm_kernel(x_ref, coefs_ref, out_ref, *, L, cutoff):
    # x_ref:     (TB, D)       VMEM block of the input
    # coefs_ref: (1, L*D)      VMEM (f32), coefs_ref[0, l*D + d] = coefs[l]
    # out_ref:   (TB, 2*L*D)   VMEM block of the output
    TB, D = x_ref.shape
    LD = L * D

    if cutoff <= 0:                       # static Python branch: everything masked
        out_ref[...] = jnp.zeros(out_ref.shape, out_ref.dtype)
        return

    x = x_ref[...].astype(jnp.float32)    # compute in f32 even for bf16 inputs
    coefs = coefs_ref[...]                # (1, LD) f32

    # kron expansion along lanes: arg[b, l*D + d] = coefs[l] * x[b, d]
    arg = jnp.tile(x, (1, L)) * coefs     # (TB, LD), VPU multiply

    s = jnp.sin(arg)                      # EUP
    c = jnp.cos(arg)                      # EUP

    if cutoff < LD:
        # Static cutoff quirk (indexes the L*D axis): put the zero tails in place with
        # a select so the assembled tile can be stored in one full-width write.
        keep = lax.broadcasted_iota(jnp.int32, (1, LD), 1) < cutoff
        s = jnp.where(keep, s, 0.0)
        c = jnp.where(keep, c, 0.0)

    # Assemble the full tile in-vreg and store once (no masked partial stores).
    out_ref[...] = jnp.concatenate([s, c], axis=-1).astype(out_ref.dtype)


def ffm_layer(x, coefs, L, frac=1.0, block_b=None):
    """Pallas implementation of FFMLayer.forward. x: (B, D)."""
    B, D = x.shape
    LD = L * D
    cutoff = int(np.round(L * frac))                 # static, as in the PyTorch code
    itemsize = jnp.dtype(x.dtype).itemsize

    # Parameter prep (glue): coefs_expanded[0, l*D + d] = coefs[l], kept in f32.
    coefs_expanded = jnp.repeat(coefs.astype(jnp.float32), D).reshape(1, LD)

    # Batch tile sizing: double-buffered in/out blocks + f32 temporaries per row,
    # against a 12 MiB budget (safe under every generation's default scoped VMEM).
    # TODO(synk): for very large L*D add a column-axis grid so temporaries stay
    # bounded while block_b grows (not needed at this module's sizes).
    if block_b is None:
        per_row = 2 * (D + 2 * LD) * itemsize + 8 * LD * 4
        block_b = max(1, min(B, (12 * 1024 * 1024) // max(per_row, 1), 512))
    block_b = min(block_b, B)
    if B >= 16:
        # Guarantee >= 2 grid steps so the "parallel" axis can shard across v7x's
        # two TensorCores (no-op on v5e/v6e).
        block_b = min(block_b, max(8, ((B // 2) // 8) * 8))
    if B >= 8:
        block_b = max(8, (block_b // 8) * 8)         # multiple of 8 sublanes
    else:
        block_b = B                                  # full-array block for tiny batches
    grid = (pl.cdiv(B, block_b),)

    kernel = functools.partial(_ffm_kernel, L=L, cutoff=cutoff)
    cost = pl.CostEstimate(
        flops=3 * B * LD,                            # kron multiply + two selects
        transcendentals=2 * B * LD,                  # sin + cos
        bytes_accessed=(B * D + LD + B * 2 * LD) * itemsize,
    )

    return pl.pallas_call(
        kernel,
        out_shape=jax.ShapeDtypeStruct((B, 2 * LD), x.dtype),
        grid=grid,
        in_specs=[
            pl.BlockSpec((block_b, D), lambda i: (i, 0)),
            pl.BlockSpec((1, LD), lambda i: (0, 0)),
        ],
        out_specs=pl.BlockSpec((block_b, 2 * LD), lambda i: (i, 0)),
        compiler_params=pltpu.CompilerParams(
            dimension_semantics=("parallel",),       # megacore split on v7x
        ),
        cost_estimate=cost,
    )(x, coefs_expanded)


def ffm_layer_ref(x, coefs, L, frac=1.0):
    """Pure-JAX reference mirroring the PyTorch forward exactly."""
    argument = jnp.kron(coefs, x)                    # (B, L*D)
    out1 = jnp.sin(argument)
    out2 = jnp.cos(argument)
    cutoff = int(np.round(L * frac))
    col = jnp.arange(argument.shape[1])
    keep = (col < cutoff)[None, :]
    out1 = jnp.where(keep, out1, 0.0)
    out2 = jnp.where(keep, out2, 0.0)
    return jnp.hstack((out1, out2))


if __name__ == "__main__":
    L = 10
    rep_dim = 2                                      # D; stored by the module, unused in forward

    # Deterministic parameter init (matches the non-trainable nn.Parameter).
    coefs = jnp.arange(1, L + 1, dtype=jnp.float32) * (math.pi * 0.5)

    key = jax.random.PRNGKey(0)
    k1, k2 = jax.random.split(key)

    ok = True
    # (batch, feature dim, explicit batch tile or None)
    configs = [
        ((8, rep_dim, None), k1),                    # module-sized input, single block
        ((64, rep_dim, 16), k2),                     # exercises the batch grid (4 steps)
    ]
    for (B, D, tb), kk in configs:
        x = jax.random.normal(kk, (B, D), dtype=jnp.float32)
        for frac in (1.0, 0.5, 0.3, 0.0):
            out = jax.block_until_ready(ffm_layer(x, coefs, L, frac=frac, block_b=tb))
            ref = ffm_layer_ref(x, coefs, L, frac=frac)
            if out.shape != (B, 2 * L * D):
                ok = False
            if not np.allclose(np.asarray(out), np.asarray(ref), atol=1e-5, rtol=1e-5):
                ok = False

    if ok:
        print("KERNEL_OK")
</pallas_src>

<mosaic_0001>
module attributes {stable_mosaic.version = 11 : i64} {
  func.func @_ffm_kernel(%arg0: i32, %arg1: memref<8x2xf32, #tpu.memory_space<vmem>>, %arg2: memref<1x20xf32, #tpu.memory_space<vmem>>, %arg3: memref<8x40xf32, #tpu.memory_space<vmem>>) attributes {dimension_semantics = [#tpu.dimension_semantics<parallel>], iteration_bounds = array<i64: 1>, scalar_prefetch = 0 : i64, scratch_operands = 0 : i64, tpu.core_type = #tpu.core_type<tc>, window_params = [{transform_indices = @transform_0, window_bounds = array<i64: 8, 2>}, {pipeline_mode = #tpu.pipeline_mode<synchronous>, transform_indices = @transform_1, window_bounds = array<i64: 1, 20>}, {transform_indices = @transform_2, window_bounds = array<i64: 8, 40>}]} {
    %c0 = arith.constant 0 : index
    %c0_0 = arith.constant 0 : index
    %0 = vector.load %arg1[%c0, %c0_0] : memref<8x2xf32, #tpu.memory_space<vmem>>, vector<8x2xf32>
    %c0_1 = arith.constant 0 : index
    %c0_2 = arith.constant 0 : index
    %1 = vector.load %arg2[%c0_1, %c0_2] : memref<1x20xf32, #tpu.memory_space<vmem>>, vector<1x20xf32>
    %2 = tpu.concatenate %0, %0, %0, %0, %0, %0, %0, %0, %0, %0 in 1 : vector<8x2xf32>, vector<8x2xf32>, vector<8x2xf32>, vector<8x2xf32>, vector<8x2xf32>, vector<8x2xf32>, vector<8x2xf32>, vector<8x2xf32>, vector<8x2xf32>, vector<8x2xf32> -> vector<8x20xf32>
    %3 = vector.broadcast %1 : vector<1x20xf32> to vector<8x20xf32>
    %4 = arith.mulf %2, %3 : vector<8x20xf32>
    %5 = math.sin %4 : vector<8x20xf32>
    %6 = math.cos %4 : vector<8x20xf32>
    %7 = tpu.iota {dimensions = array<i32: 1>} : vector<1x20xi32>
    %c10_i32 = arith.constant 10 : i32
    %8 = vector.broadcast %c10_i32 : i32 to vector<1x20xi32>
    %9 = arith.cmpi slt, %7, %8 : vector<1x20xi32>
    %cst = arith.constant 0.000000e+00 : f32
    %10 = vector.shape_cast %9 : vector<1x20xi1> to vector<1x20xi1>
    %11 = vector.broadcast %10 : vector<1x20xi1> to vector<8x20xi1>
    %12 = vector.broadcast %cst : f32 to vector<8x20xf32>
    %13 = arith.select %11, %5, %12 : vector<8x20xi1>, vector<8x20xf32>
    %cst_3 = arith.constant 0.000000e+00 : f32
    %14 = vector.shape_cast %9 : vector<1x20xi1> to vector<1x20xi1>
    %15 = vector.broadcast %14 : vector<1x20xi1> to vector<8x20xi1>
    %16 = vector.broadcast %cst_3 : f32 to vector<8x20xf32>
    %17 = arith.select %15, %6, %16 : vector<8x20xi1>, vector<8x20xf32>
    %18 = tpu.concatenate %13, %17 in 1 : vector<8x20xf32>, vector<8x20xf32> -> vector<8x40xf32>
    %c0_4 = arith.constant 0 : index
    %c0_5 = arith.constant 0 : index
    %19 = vector.load %arg3[%c0_4, %c0_5] : memref<8x40xf32, #tpu.memory_space<vmem>>, vector<8x40xf32>
    tpu.vector_store %arg3[%c0_4, %c0_5], %18 {strides = array<i32>} : memref<8x40xf32, #tpu.memory_space<vmem>>, vector<8x40xf32>,
    return
  }
  func.func @transform_0(%arg0: i32) -> (i32, i32) {
    %c0_i32 = arith.constant 0 : i32
    %c0_i32_0 = arith.constant 0 : i32
    return %arg0, %c0_i32 : i32, i32
  }
  func.func @transform_1(%arg0: i32) -> (i32, i32) {
    %c0_i32 = arith.constant 0 : i32
    %c0_i32_0 = arith.constant 0 : i32
    %c0_i32_1 = arith.constant 0 : i32
    return %c0_i32, %c0_i32_0 : i32, i32
  }
  func.func @transform_2(%arg0: i32) -> (i32, i32) {
    %c0_i32 = arith.constant 0 : i32
    %c0_i32_0 = arith.constant 0 : i32
    return %arg0, %c0_i32 : i32, i32
  }
}

</mosaic_0001>

<bundles_post_ra>
// kernel: tpu_custom_call.1
= control target key start
LH: loop header
LB: loop body
LE: loop exit
PB: predicated region body
PF: predicated region fallthrough
CT: control target
= control target key end

     0   :  { %s361_s11 = smov 2   ;;  %s362_s12 = smov 6   ;;  %s432_s0 = inlined_call_operand.vmem [shape: f32[8,2], index: 0, kind: input, shape index: {}]   ;;  %s433_s1 = inlined_call_operand.vmem [shape: f32[1,20], index: 1, kind: input, shape index: {}]   ;;  %s434_s2 = inlined_call_operand.hbm [shape: f32[8,40], index: 2, kind: output, shape index: {}]  }
   0x1   :  { %v12_v0 = vld [vmem:[%s432_s0] sm:$0xff] }
   0x2   :  { %15 = vrot.lane.b32.xlu0 %v12_v0, %s361_s11  ;;  %21 = vrot.lane.b32.xlu1 %v12_v0, %s362_s12 }
   0x3   :  { %7 = vsyncpa [#allocation3], 0  ;;  %s363_s13 = smov 4   ;;  %s364_s14 = smov 8   ;;  %vm42_vm0 = vcmask 15360   ;;  %vm44_vm1 = vcmask 31744  }
   0x4   :  { %s365_s15 = smov 10   ;;  %s366_s16 = smov 12   ;;  %vm46_vm2 = vcmask 48128   ;;  %vm48_vm3 = vcmask 64512   ;;  %vm50_vm4 = vcmask 80896   ;;  %vm52_vm5 = vcmask 97280  }
   0x5   :  { %s367_s17 = smov 14   ;;  %s368_s18 = smov 16   ;;  %vm54_vm6 = vcmask 113664   ;;  %vm56_vm7 = vcmask 130048   ;;  %vm58_vm8 = vcmask 146432  }
   0x6   :  { %18 = vrot.lane.b32.xlu0 %v12_v0, %s363_s13  ;;  %24 = vrot.lane.b32.xlu1 %v12_v0, %s364_s14  ;;  %s369_s19 = smov 18   ;;  %v303_v16 = vld [vmem:[%s433_s1] ss:$0 sm:$0xff]  ;;  %v370_v32 = vmov 2102212464   ;;  %s376_s1 = smov 20  }
   0x7   :  { %v371_v34 = vmov 920167782   ;;  %v372_v38 = vmov 1326507024   ;;  %v373_v40 = vmov 683565275  }
   0x8   :  { %v374_v42 = vmov 2475754826   ;;  %v375_v45 = vmov 2131351028   ;;  %s377_s21 = smov [#allocation2]  }
   0x9   :  { %s295_s22 = sshll.u32 %s377_s21, 4  ;;  %s296_s22 = int_to_ptr.vmem [resolvable:$true] %s295_s22 }
   0xa   :  { %27 = vrot.lane.b32.xlu0 %v12_v0, %s365_s15  ;;  %30 = vrot.lane.b32.xlu1 %v12_v0, %s366_s16  ;;  %s337_s23 = scalar_lea.vmem %s296_s22, 128  ;;  %p342_p1 = scmp.lt.s32.totalorder %s296_s22, %s296_s22 }
   0xb   :  { %p338_p0 = scmp.ne.s32.totalorder %s296_s22, %s337_s23  ;;  %p343_p2 = scmp.lt.s32.totalorder %s337_s23, %s337_s23 }
   0xd   :  { %p344_p3 = por %p343_p2, %p342_p1 }
   0xe   :  { %33 = vrot.lane.b32.xlu0 %v12_v0, %s367_s17  ;;  %36 = vrot.lane.b32.xlu1 %v12_v0, %s368_s18 }
   0xf   :  { %p345_p4 = pnand %p344_p3, %p338_p0 }
  0x12   :  { %39 = vrot.lane.b32.xlu0 %v12_v0, %s369_s19 }
  0x74   :  { %v16_v1 = vpop.permute.xlu0 %15  ;;  %v22_v2 = vpop.permute.xlu1 %21 }
  0x75   :  { %v43_v3 = vsel %vm42_vm0, %v12_v0, %v16_v1 }
  0x78   :  { %v19_v4 = vpop.permute.xlu0 %18  ;;  %v25_v5 = vpop.permute.xlu1 %24 }
  0x79   :  { %v45_v6 = vsel %vm44_vm1, %v43_v3, %v19_v4 }
  0x7a   :  { %v47_v7 = vsel %vm46_vm2, %v45_v6, %v22_v2 }
  0x7b   :  { %v49_v8 = vsel %vm48_vm3, %v47_v7, %v25_v5 }
  0x7c   :  { %v28_v9 = vpop.permute.xlu0 %27  ;;  %v31_v10 = vpop.permute.xlu1 %30 }
  0x7d   :  { %v51_v11 = vsel %vm50_vm4, %v49_v8, %v28_v9 }
  0x7e   :  { %v53_v12 = vsel %vm52_vm5, %v51_v11, %v31_v10 }
  0x80   :  { %v34_v13 = vpop.permute.xlu0 %33  ;;  %v37_v15 = vpop.permute.xlu1 %36 }
  0x81   :  { %v55_v14 = vsel %vm54_vm6, %v53_v12, %v34_v13 }
  0x82   :  { %v57_v17 = vsel %vm56_vm7, %v55_v14, %v37_v15 }
  0x84   :  { %v40_v18 = vpop.permute.xlu0 %39 }
  0x85   :  { %v59_v19 = vsel %vm58_vm8, %v57_v17, %v40_v18 }
  0x86   :  { %v399_v20 = vmul.f32 %v303_v16, %v59_v19 }
  0x88   :  { %v70_v21 = vand.u32 2139095040, %v399_v20  ;;  %v67_v22 = vand.u32 2147483647, %v399_v20  ;;  %vm69_vm0 = vcmp.lt.s32.totalorder %v399_v20, 0 }
  0x8a   :  { %v71_v23 = vshrl.u32 %v70_v21, 23  ;;  %v74_v25 = vand.u32 8388607, %v67_v22  ;;  %vm68_vm1 = vcmp.le.f32.partialorder %v67_v22, 0.7853982 }
  0x8c   :  { %v304_v24 = vadd.s32 4294967169, %v71_v23  ;;  %v75_v28 = vor.u32 8388608, %v74_v25 }
  0x8e   :  { %v77_v26 = vadd.s32 1, %v304_v24  ;;  %v115_v36 = vshll.u32 %v75_v28, 8 }
  0x90   :  { %vm78_vm9 = vcmp.gt.s32.totalorder %v77_v26, 0 }
  0x91   :  { %v79_v27 = vsel %vm78_vm9, %v77_v26, 0  ;;  %vm159_vm9 = vweird.f32 %v399_v20 }
  0x92   :  { %v81_v29 = vand.u32 31, %v79_v27  ;;  %v80_v30 = vshrl.u32 %v79_v27, 5 }
  0x94   :  { %v82_v31 = vsub.s32 32, %v81_v29  ;;  %v93_v33 = vshll.u32 %v370_v32, %v81_v29  ;;  %v96_v35 = vshll.u32 %v371_v34, %v81_v29  ;;  %v84_v41 = vshll.u32 %v373_v40, %v81_v29 }
  0x95   :  { %v87_v44 = vshll.u32 %v374_v42, %v81_v29  ;;  %v90_v47 = vshll.u32 %v375_v45, %v81_v29  ;;  %vm102_vm10 = vcmp.lt.s32.totalorder %v80_v30, 4  ;;  %vm99_vm11 = vcmp.lt.s32.totalorder %v80_v30, 1 }
  0x96   :  { %v94_v37 = vshrl.u32 %v371_v34, %v82_v31  ;;  %v97_v39 = vshrl.u32 %v372_v38, %v82_v31  ;;  %v85_v43 = vshrl.u32 %v374_v42, %v82_v31  ;;  %v88_v46 = vshrl.u32 %v375_v45, %v82_v31 }
  0x97   :  { %v91_v48 = vshrl.u32 %v370_v32, %v82_v31  ;;  %v83_v52 = vshrl.u32 %v373_v40, %v82_v31  ;;  %vm100_vm12 = vcmp.lt.s32.totalorder %v80_v30, 2  ;;  %vm101_vm13 = vcmp.lt.s32.totalorder %v80_v30, 3 }
  0x98   :  { %v95_v49 = vor.u32 %v94_v37, %v93_v33  ;;  %v98_v50 = vor.u32 %v97_v39, %v96_v35  ;;  %v86_v51 = vor.u32 %v85_v43, %v84_v41  ;;  %v89_v53 = vor.u32 %v88_v46, %v87_v44 }
  0x99   :  { %v92_v54 = vor.u32 %v91_v48, %v90_v47  ;;  %v274_v41 = vlaneseq }
  0x9a   :  { %v108_v55 = vsel %vm102_vm10, %v95_v49, 920167782  ;;  %v112_v56 = vsel %vm102_vm10, %v98_v50, 1326507024  ;;  %v107_v58 = vsel %vm99_vm11, %v86_v51, %v89_v53  ;;  %v103_v61 = vsel %vm99_vm11, %v83_v52, %v86_v51 }
  0x9b   :  { %v104_v57 = vsel %vm102_vm10, %v92_v54, 2102212464  ;;  %v109_v59 = vsel %vm101_vm13, %v92_v54, %v108_v55  ;;  %v111_v60 = vsel %vm99_vm11, %v89_v53, %v92_v54  ;;  %v113_v0 = vsel %vm101_vm13, %v95_v49, %v112_v56 }
  0x9c   :  { %v105_v62 = vsel %vm101_vm13, %v89_v53, %v104_v57  ;;  %v110_v63 = vsel %vm100_vm12, %v107_v58, %v109_v59  ;;  %v114_v1 = vsel %vm100_vm12, %v111_v60, %v113_v0  ;;  %v275_v44 = vand.u32 127, %v274_v41 }
  0x9d   :  { %v405_v2 = vmul.u32.u64.low %v115_v36, %v110_v63  ;;  %v406_v3 = vmul.u32.u64.high %v115_v36, %v110_v63, %v405_v2  ;;  %v408_v4 = vmul.u32.u64.low %v115_v36, %v114_v1  ;;  %v409_v5 = vmul.u32.u64.high %v115_v36, %v114_v1, %v408_v4 }
  0x9e   :  { %v106_v6 = vsel %vm100_vm12, %v103_v61, %v105_v62  ;;  %vm276_vm4 = vcmp.lt.s32.totalorder %v275_v44, 10  ;;  %vm285_vm10 = vcmask 162816   ;;  %vm287_vm11 = vcmask 326656  }
  0x9f   :  { %v125_v7 = vadd.s32 1, %v406_v3  ;;  %v122_v8 = vmul.u32 %v115_v36, %v106_v6  ;;  %vm124_vm14 = vc.u32 %v409_v5, %v405_v2  ;;  %v123_v21 = vadd.s32 %v405_v2, %v409_v5 }
  0xa1   :  { %v126_v9 = vsel %vm124_vm14, %v125_v7, %v406_v3 }
  0xa2   :  { %v127_v10 = vadd.s32 %v126_v9, %v122_v8 }
  0xa4   :  { %v128_v11 = vadd.s32 536870912, %v127_v10 }
  0xa6   :  { %v129_v12 = vshrl.u32 %v128_v11, 30 }
  0xa8   :  { %v130_v13 = vshll.u32 %v129_v12, 30  ;;  %v153_v34 = vsub.s32 4, %v129_v12 }
  0xaa   :  { %v131_v14 = vsub.s32 %v127_v10, %v130_v13  ;;  %v154_v37 = vsel %vm69_vm0, %v153_v34, %v129_v12 }
  0xab   :  { %v156_v39 = vsel %vm68_vm1, 0, %v154_v37 }
  0xac   :  { %v133_v15 = vsub.s32 0, %v131_v14  ;;  %v160_v40 = vadd.s32 3, %v156_v39  ;;  %v264_v43 = vand.u32 3, %v156_v39 }
  0xae   :  { %v305_v16 = vmin.u32 %v133_v15, %v131_v14  ;;  %v161_v42 = vand.u32 3, %v160_v40  ;;  %vm269_vm3 = vcmp.eq.s32.totalorder %v264_v43, 2  ;;  %vm266_vm6 = vcmp.eq.s32.totalorder %v264_v43, 0 }
  0xaf   :  { %vm265_vm8 = vcmp.lt.s32.totalorder %v264_v43, 2 }
  0xb0   :  { %v135_v17 = vclz %v305_v16  ;;  %vm166_vm2 = vcmp.eq.s32.totalorder %v161_v42, 2  ;;  %vm163_vm5 = vcmp.eq.s32.totalorder %v161_v42, 0  ;;  %vm162_vm7 = vcmp.lt.s32.totalorder %v161_v42, 2 }
  0xb2   :  { %v306_v18 = vadd.s32 4294967294, %v135_v17 }
  0xb4   :  { %vm307_vm15 = vcmp.lt.s32.totalorder %v306_v18, 0 }
  0xb5   :  { %v138_v19 = vsel %vm307_vm15, 0, %v306_v18 }
  0xb6   :  { %v139_v23 = vsub.s32 32, %v138_v19  ;;  %v143_v24 = vsub.s32 4294967266, %v138_v19  ;;  %v140_v25 = vshll.u32 %v131_v14, %v138_v19 }
  0xb8   :  { %v141_v26 = vshrl.u32 %v123_v21, %v139_v23  ;;  %v144_v27 = vadd.s32 127, %v143_v24 }
  0xba   :  { %v142_v28 = vor.u32 %v141_v26, %v140_v25  ;;  %v145_v29 = vshll.u32 %v144_v27, 23 }
  0xbc   :  { %v146_v30 = vor.u32 4788187, %v145_v29  ;;  %v149_v32 = vcvt.s32.f32 %v142_v28 }
  0xbe   :  { %v147_v31 = vand.u32 2147483647, %v146_v30 }
  0xc0   :  { %v150_v33 = vmul.f32 %v149_v32, %v147_v31 }
  0xc2   :  { %v151_v35 = vxor.u32 2147483648, %v150_v33 }
  0xc4   :  { %v152_v36 = vsel %vm69_vm0, %v151_v35, %v150_v33 }
  0xc5   :  { %v155_v38 = vsel %vm68_vm1, %v399_v20, %v152_v36 }
  0xc6   :  { %333 = vcosq.f32 %v155_v38 }
  0xc7   :  { %335 = vsinq.f32 %v155_v38 }
  0xd0   :  { %v334_v45 = vpop.eup %333 }
  0xd1   :  { %v336_v46 = vpop.eup %335  ;;  %v167_v47 = vxor.u32 2147483648, %v334_v45 }
  0xd2   :  { %v164_v48 = vxor.u32 2147483648, %v336_v46 }
  0xd3   :  { %v271_v22 = vsel %vm269_vm3, %v167_v47, %v336_v46  ;;  %v168_v49 = vsel %vm166_vm2, %v167_v47, %v336_v46 }
  0xd4   :  { %v268_v50 = vsel %vm266_vm6, %v334_v45, %v164_v48  ;;  %v165_v51 = vsel %vm163_vm5, %v334_v45, %v164_v48 }
  0xd5   :  { %v272_v52 = vsel %vm265_vm8, %v268_v50, %v271_v22  ;;  %v169_v53 = vsel %vm162_vm7, %v165_v51, %v168_v49 }
  0xd6   :  { %v273_v54 = vsel %vm159_vm9, nan, %v272_v52  ;;  %v170_v55 = vsel %vm159_vm9, nan, %v169_v53 }
  0xd7   :  { %v280_v56 = vsel %vm276_vm4, %v273_v54, 0.0  ;;  %v279_v57 = vsel %vm276_vm4, %v170_v55, 0.0 }
  0xd8   :  { %282 = vrot.lane.b32.xlu1 %v280_v56, %s376_s1 }
 0x14a   :  { %v283_v58 = vpop.permute.xlu1 %282 }
 0x14b   :  { %v286_v59 = vsel %vm285_vm10, %v279_v57, %v283_v58 }
 0x14c   :  { %288 = vst.msk [vmem:[#allocation2] sm:$0xff] %vm287_vm11, %v286_v59 }
 0x14d   :  { %348 = shalt.err (!%p345_p4)
}
 0x14e   :  { %s349_s26 = scalar_lea.hbm %s434_s2, 128 }
 0x14f   :  { %p350_p5 = scmp.ne.s32.totalorder %s434_s2, %s349_s26  ;;  %p353_p6 = scmp.lt.u32.totalorder %s349_s26, %s434_s2 }
 0x151   :  { %p355_p7 = pnand %p353_p6, %p350_p5 }
 0x153   :  { %358 = shalt.err (!%p355_p7)
}
 0x154   :  { %298 = dma.vmem_to_hbm [thread:$0]  %s296_s22, 128, %s434_s2, [#allocation3]  }
 0x155   :  { %359 = dma.done.wait [#allocation3], 128  }
 0x156   :  { %360 = vsyncadd [#allocation3], 4294967168 }
 0x157   :  { %302 = vsyncpa [#allocation3], 1 }

</bundles_post_ra>
